<compile_context>
chip_gen: v5e
topology: v5e:2x2
jax: 0.10.0
libtpu: 0.0.40
codegen_flags: <defaults>
</compile_context>

<pallas_src>
import functools
import math

import jax
import jax.numpy as jnp
from jax.experimental import pallas as pl
from jax.experimental.pallas import tpu as pltpu

EPS = 1e-5  # torch.nn.functional.group_norm default eps


def _round_up(x, m):
    return (x + m - 1) // m * m


# ----------------------- shared GroupNorm(1) affine + ReLU epilogue ------------------------

def _gn_relu_store(acc, gamma_ref, beta_ref, o_ref, true_cout, true_p):
    """acc: (Coutp, Pp) f32 with padded rows/columns exactly zero.

    Normalizes over the TRUE Cout*P element count only, applies the per-channel affine and
    ReLU, and stores the lane-dense block."""
    coutp, pp = acc.shape
    cnt = float(true_cout * true_p)
    n_pad = float(coutp * pp - true_cout * true_p)

    mean = jnp.sum(acc) * (1.0 / cnt)
    # Centered sum of squares (better conditioned than E[y^2] - mean^2). Every padded entry is
    # exactly zero, so each contributes (0 - mean)^2 = mean^2 to the raw sum; subtract those.
    css = jnp.sum((acc - mean) * (acc - mean)) - n_pad * mean * mean
    inv = jax.lax.rsqrt(css * (1.0 / cnt) + EPS)

    scale = gamma_ref[...] * inv                     # (Coutp, 1), lane-broadcast below
    shift = beta_ref[...] - mean * scale
    o_ref[0] = jnp.maximum(acc * scale + shift, 0.0).astype(o_ref.dtype)


# ----------------------- fused kernels ------------------------------------------------------

def _conv_gn_relu_same_kernel(x_ref, w_ref, mask_ref, gamma_ref, beta_ref, o_ref,
                              *, K, W, Pp, true_cout, true_p):
    # x_ref:    (1, Cin, L)        bf16  one sample: H-padded, flattened, lane-dense
    # w_ref:    (K*K, Coutp, Cin)  bf16  one (Coutp, Cin) tap matrix per (kh, kw)
    # mask_ref: (Kp, Pp)           bf16  row kw zeroes W-wraparound columns and the f >= P tail
    # o_ref:    (1, Coutp, Pp)     f32
    coutp = o_ref.shape[1]
    acc = jnp.zeros((coutp, Pp), jnp.float32)
    for kh in range(K):
        for kw in range(K):
            # Tap (kh, kw) of a "same" conv == a pure shift by kh*W + kw in this flat layout.
            d = kh * W + kw
            slab = x_ref[0, :, d:d + Pp]                      # (Cin, Pp), static lane slice
            slab = slab * mask_ref[pl.ds(kw, 1), :]           # zero the W-pad / tail columns
            acc = acc + jnp.dot(w_ref[kh * K + kw], slab,
                                preferred_element_type=jnp.float32)
    _gn_relu_store(acc, gamma_ref, beta_ref, o_ref, true_cout, true_p)


def _conv_gn_relu_general_kernel(p_ref, w_ref, gamma_ref, beta_ref, o_ref,
                                 *, true_cout, true_p):
    # p_ref: (1, CKp, Pp) bf16 im2col patches     w_ref: (Coutp, CKp) bf16
    acc = jnp.dot(w_ref[...], p_ref[0], preferred_element_type=jnp.float32)
    _gn_relu_store(acc, gamma_ref, beta_ref, o_ref, true_cout, true_p)


# ----------------------- host-side paths ----------------------------------------------------

def _conv_gn_relu_same(x, conv_w, gamma2d, beta2d, *, padding, Coutp, Pp, P):
    """Fast path: stride=1, Ho==H, Wo==W. In-kernel im2col via shifted flat slices."""
    N, Cin, H, W = x.shape
    Cout, _, K, _ = conv_w.shape

    # H-padded, flattened, lane-dense layout with `padding` zeros prepended (absorbs kw-padding
    # < 0 shifts) and enough zeros appended for the largest tap offset; rounded to 128 lanes.
    flat_len = (H + 2 * padding) * W
    L = _round_up(max((K - 1) * W + (K - 1) + Pp, padding + flat_len), 128)
    x_flat = jnp.pad(x, ((0, 0), (0, 0), (padding, padding), (0, 0))).reshape(N, Cin, flat_len)
    x_ext = jnp.pad(x_flat, ((0, 0), (0, 0), (padding, L - padding - flat_len)))
    x_ext = x_ext.astype(jnp.bfloat16)

    # Per-tap weights: w_taps[kh*K+kw] = conv_w[:, :, kh, kw]; Cout padded only to the bf16
    # sublane granule (more padding would not raise MXU throughput, only HBM traffic).
    w_taps = jnp.transpose(conv_w, (2, 3, 0, 1)).reshape(K * K, Cout, Cin).astype(jnp.float32)
    w_taps = jnp.pad(w_taps, ((0, 0), (0, Coutp - Cout), (0, 0))).astype(jnp.bfloat16)

    # Column masks: zero columns where the flat shift would wrap across a row (where the true
    # conv reads W-padding) and the Pp > P tail, so padded output entries stay exactly zero and
    # never bias the GroupNorm statistics.
    f = jnp.arange(Pp)
    ow = f % W
    Kp = _round_up(K, 8)
    rows = [(((ow + kw - padding) >= 0) & ((ow + kw - padding) < W) & (f < P))
            for kw in range(K)]
    mask = jnp.stack(rows).astype(jnp.float32)
    mask = jnp.pad(mask, ((0, Kp - K), (0, 0))).astype(jnp.bfloat16)

    est = (2 * Cin * L * 2                 # x block, bf16, double-buffered
           + 2 * K * K * Coutp * Cin * 2   # per-tap weights
           + 2 * Kp * Pp * 2               # masks
           + 2 * Coutp * Pp * 4            # out block, double-buffered
           + Coutp * Pp * 4                # resident accumulator
           + 2 * Cin * Pp * 2              # slab temporaries
           + 4 * Coutp * 4)                # gamma/beta
    vmem_limit = min(max(2 * est, 32 << 20), 48 << 20)

    kernel = functools.partial(_conv_gn_relu_same_kernel, K=K, W=W, Pp=Pp,
                               true_cout=Cout, true_p=P)
    return pl.pallas_call(
        kernel,
        out_shape=jax.ShapeDtypeStruct((N, Coutp, Pp), jnp.float32),
        grid_spec=pltpu.PrefetchScalarGridSpec(
            num_scalar_prefetch=0,
            grid=(N,),
            in_specs=[
                pl.BlockSpec((1, Cin, L), lambda n: (n, 0, 0)),
                pl.BlockSpec((K * K, Coutp, Cin), lambda n: (0, 0, 0)),
                pl.BlockSpec((Kp, Pp), lambda n: (0, 0)),
                pl.BlockSpec((Coutp, 1), lambda n: (0, 0)),
                pl.BlockSpec((Coutp, 1), lambda n: (0, 0)),
            ],
            out_specs=pl.BlockSpec((1, Coutp, Pp), lambda n: (n, 0, 0)),
        ),
        compiler_params=pltpu.CompilerParams(
            dimension_semantics=("parallel",),
            vmem_limit_bytes=vmem_limit),
        cost_estimate=pl.CostEstimate(
            flops=2 * N * Coutp * Cin * K * K * Pp,
            transcendentals=N,
            bytes_accessed=(N * Cin * L * 2 + K * K * Coutp * Cin * 2 + Kp * Pp * 2
                            + N * Coutp * Pp * 4)),
    )(x_ext, w_taps, mask, gamma2d, beta2d)


def _extract_patches_ck_p(x, K, stride, padding):
    """x: (N, Cin, H, W) -> im2col patches in the lane-dense layout (N, Cin*K*K, Ho*Wo).

    CK ordering is cin*K*K + kh*K + kw, matching conv_w.reshape(Cout, -1)."""
    N, Cin, H, W = x.shape
    Ho = (H + 2 * padding - K) // stride + 1
    Wo = (W + 2 * padding - K) // stride + 1
    xp = jnp.pad(x, ((0, 0), (0, 0), (padding, padding), (padding, padding)))
    cols = []
    for kh in range(K):
        for kw in range(K):
            cols.append(xp[:, :, kh:kh + (Ho - 1) * stride + 1:stride,
                              kw:kw + (Wo - 1) * stride + 1:stride])   # (N, Cin, Ho, Wo)
    p = jnp.stack(cols, axis=2)                                         # (N, Cin, K*K, Ho, Wo)
    return p.reshape(N, Cin * K * K, Ho * Wo)                           # lane-dense, no transpose


def _conv_gn_relu_general(x, conv_w, gamma2d, beta2d, *, stride, padding, Coutp, Pp, P):
    """Fallback for strided / non-"same" convs: host-side im2col + the same fused kernel."""
    # TODO(synk): extend the in-kernel shifted-tap path to strided / valid convolutions so this
    # K*K-fold im2col HBM materialization disappears for them as well.
    N, Cin, H, W = x.shape
    Cout, _, K, _ = conv_w.shape
    CK = Cin * K * K
    CKp = _round_up(CK, 256) if CK > 128 else 128   # match the 256-wide v6e/v7x MXU K tile

    patches = _extract_patches_ck_p(x, K, stride, padding)
    patches = jnp.pad(patches, ((0, 0), (0, CKp - CK), (0, Pp - P))).astype(jnp.bfloat16)
    w2d = jnp.pad(conv_w.reshape(Cout, CK).astype(jnp.float32),
                  ((0, Coutp - Cout), (0, CKp - CK))).astype(jnp.bfloat16)

    est = (2 * CKp * Pp * 2 + 2 * Coutp * CKp * 2 + 2 * Coutp * Pp * 4
           + Coutp * Pp * 4 + 4 * Coutp * 4)
    vmem_limit = min(max(2 * est, 32 << 20), 48 << 20)

    kernel = functools.partial(_conv_gn_relu_general_kernel, true_cout=Cout, true_p=P)
    return pl.pallas_call(
        kernel,
        out_shape=jax.ShapeDtypeStruct((N, Coutp, Pp), jnp.float32),
        grid_spec=pltpu.PrefetchScalarGridSpec(
            num_scalar_prefetch=0,
            grid=(N,),
            in_specs=[
                pl.BlockSpec((1, CKp, Pp), lambda n: (n, 0, 0)),
                pl.BlockSpec((Coutp, CKp), lambda n: (0, 0)),
                pl.BlockSpec((Coutp, 1), lambda n: (0, 0)),
                pl.BlockSpec((Coutp, 1), lambda n: (0, 0)),
            ],
            out_specs=pl.BlockSpec((1, Coutp, Pp), lambda n: (n, 0, 0)),
        ),
        compiler_params=pltpu.CompilerParams(
            dimension_semantics=("parallel",),
            vmem_limit_bytes=vmem_limit),
        cost_estimate=pl.CostEstimate(
            flops=2 * N * Coutp * CKp * Pp,
            transcendentals=N,
            bytes_accessed=N * CKp * Pp * 2 + Coutp * CKp * 2 + N * Coutp * Pp * 4),
    )(patches, w2d, gamma2d, beta2d)


def conv2d_block_forward(x, conv_w, gamma, beta, *, stride=1, padding=0):
    """x: (N, Cin, H, W) NCHW.  conv_w: (Cout, Cin, K, K).  Returns (N, Cout, Ho, Wo) f32."""
    N, Cin, H, W = x.shape
    Cout, _, K, _ = conv_w.shape
    Ho = (H + 2 * padding - K) // stride + 1
    Wo = (W + 2 * padding - K) // stride + 1
    P = Ho * Wo

    Coutp = _round_up(Cout, 16)          # bf16 sublane packing granule
    Pp = _round_up(P, 128)               # lane-dense output width -> unmasked full stores

    gamma2d = jnp.pad(gamma.astype(jnp.float32).reshape(Cout, 1), ((0, Coutp - Cout), (0, 0)))
    beta2d = jnp.pad(beta.astype(jnp.float32).reshape(Cout, 1), ((0, Coutp - Cout), (0, 0)))

    if stride == 1 and Ho == H and Wo == W:
        out = _conv_gn_relu_same(x, conv_w, gamma2d, beta2d,
                                 padding=padding, Coutp=Coutp, Pp=Pp, P=P)
    else:
        out = _conv_gn_relu_general(x, conv_w, gamma2d, beta2d, stride=stride,
                                    padding=padding, Coutp=Coutp, Pp=Pp, P=P)

    # Lane-dense output: only slice + reshape, no transpose pass over HBM.
    return out[:, :Cout, :P].reshape(N, Cout, Ho, Wo)


# ----------------------- init + reference ---------------------------------------------------

def init_params(key, in_channels, out_channels, kernel_size):
    # kaiming_uniform_(weight, nonlinearity='relu'): gain=sqrt(2), bound=gain*sqrt(3/fan_in)
    fan_in = in_channels * kernel_size * kernel_size
    bound = math.sqrt(2.0) * math.sqrt(3.0 / fan_in)
    conv_w = jax.random.uniform(
        key, (out_channels, in_channels, kernel_size, kernel_size),
        minval=-bound, maxval=bound, dtype=jnp.float32)
    gamma = jnp.ones((out_channels,), jnp.float32)   # GroupNorm weight
    beta = jnp.zeros((out_channels,), jnp.float32)   # GroupNorm bias
    return conv_w, gamma, beta


def _reference(x, conv_w, gamma, beta, stride, padding):
    # Pure-JAX reference. Inputs are rounded to bf16 to mirror the kernel's MXU feed
    # (the only intended numerical deviation from the f32 PyTorch module).
    xb = x.astype(jnp.bfloat16).astype(jnp.float32)
    wb = conv_w.astype(jnp.bfloat16).astype(jnp.float32)
    y = jax.lax.conv_general_dilated(
        xb, wb, window_strides=(stride, stride),
        padding=[(padding, padding), (padding, padding)],
        dimension_numbers=("NCHW", "OIHW", "NCHW"),
        precision=jax.lax.Precision.HIGHEST)
    mean = jnp.mean(y, axis=(1, 2, 3), keepdims=True)
    var = jnp.mean((y - mean) ** 2, axis=(1, 2, 3), keepdims=True)
    yhat = (y - mean) * jax.lax.rsqrt(var + EPS)
    out = yhat * gamma[None, :, None, None] + beta[None, :, None, None]
    return jnp.maximum(out, 0.0)


if __name__ == "__main__":
    key = jax.random.PRNGKey(0)
    k_x, k_w1, k_w2 = jax.random.split(key, 3)

    N, Cin, H, W = 2, 4, 16, 16
    x = jax.random.normal(k_x, (N, Cin, H, W), dtype=jnp.float32)

    # Case 1: "same" conv (stride=1, padding=(K-1)/2) -> fused in-kernel-im2col fast path.
    Cout, K, stride, padding = 8, 3, 1, 1
    conv_w, gamma, beta = init_params(k_w1, Cin, Cout, K)
    gamma = jnp.linspace(0.5, 1.5, Cout, dtype=jnp.float32)   # exercise the affine path
    beta = jnp.linspace(-0.1, 0.1, Cout, dtype=jnp.float32)
    fwd = jax.jit(functools.partial(conv2d_block_forward, stride=stride, padding=padding))
    out = jax.block_until_ready(fwd(x, conv_w, gamma, beta))
    ref = _reference(x, conv_w, gamma, beta, stride, padding)
    assert out.shape == (N, Cout, H, W)
    assert jnp.allclose(out, ref, atol=2e-3, rtol=2e-3), float(jnp.max(jnp.abs(out - ref)))

    # Case 2: strided / valid conv -> general im2col fallback path (still fully fused).
    Cout2, K2, stride2, padding2 = 6, 3, 2, 0
    conv_w2, gamma2, beta2 = init_params(k_w2, Cin, Cout2, K2)
    fwd2 = jax.jit(functools.partial(conv2d_block_forward, stride=stride2, padding=padding2))
    out2 = jax.block_until_ready(fwd2(x, conv_w2, gamma2, beta2))
    ref2 = _reference(x, conv_w2, gamma2, beta2, stride2, padding2)
    assert out2.shape == ref2.shape
    assert jnp.allclose(out2, ref2, atol=2e-3, rtol=2e-3), float(jnp.max(jnp.abs(out2 - ref2)))

    print("KERNEL_OK")
</pallas_src>

<mosaic_0001>
module attributes {stable_mosaic.version = 11 : i64} {
  func.func @_conv_gn_relu_same_kernel(%arg0: i32, %arg1: memref<1x4x384xbf16, #tpu.memory_space<vmem>>, %arg2: memref<9x16x4xbf16, #tpu.memory_space<vmem>>, %arg3: memref<8x256xbf16, #tpu.memory_space<vmem>>, %arg4: memref<16x1xf32, #tpu.memory_space<vmem>>, %arg5: memref<16x1xf32, #tpu.memory_space<vmem>>, %arg6: memref<1x16x256xf32, #tpu.memory_space<vmem>>) attributes {dimension_semantics = [#tpu.dimension_semantics<parallel>], iteration_bounds = array<i64: 2>, scalar_prefetch = 0 : i64, scratch_operands = 0 : i64, tpu.core_type = #tpu.core_type<tc>, window_params = [{transform_indices = @transform_0, window_bounds = array<i64: 1, 4, 384>}, {pipeline_mode = #tpu.pipeline_mode<synchronous>, transform_indices = @transform_1, window_bounds = array<i64: 9, 16, 4>}, {pipeline_mode = #tpu.pipeline_mode<synchronous>, transform_indices = @transform_2, window_bounds = array<i64: 8, 256>}, {pipeline_mode = #tpu.pipeline_mode<synchronous>, transform_indices = @transform_3, window_bounds = array<i64: 16, 1>}, {pipeline_mode = #tpu.pipeline_mode<synchronous>, transform_indices = @transform_4, window_bounds = array<i64: 16, 1>}, {transform_indices = @transform_5, window_bounds = array<i64: 1, 16, 256>}]} {
    %cst = arith.constant 0.000000e+00 : f32
    %0 = vector.broadcast %cst : f32 to vector<16x256xf32>
    %c0 = arith.constant 0 : index
    %c0_0 = arith.constant 0 : index
    %c0_1 = arith.constant 0 : index
    %1 = vector.load %arg1[%c0, %c0_0, %c0_1] : memref<1x4x384xbf16, #tpu.memory_space<vmem>>, vector<1x4x256xbf16>
    %2 = vector.shape_cast %1 : vector<1x4x256xbf16> to vector<4x256xbf16>
    %c0_2 = arith.constant 0 : index
    %c0_3 = arith.constant 0 : index
    %3 = vector.load %arg3[%c0_2, %c0_3] : memref<8x256xbf16, #tpu.memory_space<vmem>>, vector<1x256xbf16>
    %4 = vector.broadcast %3 : vector<1x256xbf16> to vector<4x256xbf16>
    %5 = arith.mulf %2, %4 : vector<4x256xbf16>
    %c0_4 = arith.constant 0 : index
    %c0_5 = arith.constant 0 : index
    %c0_6 = arith.constant 0 : index
    %6 = vector.load %arg2[%c0_4, %c0_5, %c0_6] : memref<9x16x4xbf16, #tpu.memory_space<vmem>>, vector<1x16x4xbf16>
    %7 = vector.shape_cast %6 : vector<1x16x4xbf16> to vector<16x4xbf16>
    %cst_7 = arith.constant dense<0.000000e+00> : vector<16x256xf32>
    %8 = tpu.matmul %7, %5, %cst_7 {dimension_numbers = #tpu.dot_dimension_numbers<[1], [0], [0], [1], [0, 0, 1, 1], [], []>} : vector<16x4xbf16>, vector<4x256xbf16>, vector<16x256xf32> -> vector<16x256xf32>
    %9 = arith.addf %0, %8 : vector<16x256xf32>
    %c0_8 = arith.constant 0 : index
    %c0_9 = arith.constant 0 : index
    %c1 = arith.constant 1 : index
    %10 = vector.load %arg1[%c0_8, %c0_9, %c1] : memref<1x4x384xbf16, #tpu.memory_space<vmem>>, vector<1x4x256xbf16>
    %11 = vector.shape_cast %10 : vector<1x4x256xbf16> to vector<4x256xbf16>
    %c1_10 = arith.constant 1 : index
    %c0_11 = arith.constant 0 : index
    %12 = vector.load %arg3[%c1_10, %c0_11] : memref<8x256xbf16, #tpu.memory_space<vmem>>, vector<1x256xbf16>
    %13 = vector.broadcast %12 : vector<1x256xbf16> to vector<4x256xbf16>
    %14 = arith.mulf %11, %13 : vector<4x256xbf16>
    %c1_12 = arith.constant 1 : index
    %c0_13 = arith.constant 0 : index
    %c0_14 = arith.constant 0 : index
    %15 = vector.load %arg2[%c1_12, %c0_13, %c0_14] : memref<9x16x4xbf16, #tpu.memory_space<vmem>>, vector<1x16x4xbf16>
    %16 = vector.shape_cast %15 : vector<1x16x4xbf16> to vector<16x4xbf16>
    %cst_15 = arith.constant dense<0.000000e+00> : vector<16x256xf32>
    %17 = tpu.matmul %16, %14, %cst_15 {dimension_numbers = #tpu.dot_dimension_numbers<[1], [0], [0], [1], [0, 0, 1, 1], [], []>} : vector<16x4xbf16>, vector<4x256xbf16>, vector<16x256xf32> -> vector<16x256xf32>
    %18 = arith.addf %9, %17 : vector<16x256xf32>
    %c0_16 = arith.constant 0 : index
    %c0_17 = arith.constant 0 : index
    %c2 = arith.constant 2 : index
    %19 = vector.load %arg1[%c0_16, %c0_17, %c2] : memref<1x4x384xbf16, #tpu.memory_space<vmem>>, vector<1x4x256xbf16>
    %20 = vector.shape_cast %19 : vector<1x4x256xbf16> to vector<4x256xbf16>
    %c2_18 = arith.constant 2 : index
    %c0_19 = arith.constant 0 : index
    %21 = vector.load %arg3[%c2_18, %c0_19] : memref<8x256xbf16, #tpu.memory_space<vmem>>, vector<1x256xbf16>
    %22 = vector.broadcast %21 : vector<1x256xbf16> to vector<4x256xbf16>
    %23 = arith.mulf %20, %22 : vector<4x256xbf16>
    %c2_20 = arith.constant 2 : index
    %c0_21 = arith.constant 0 : index
    %c0_22 = arith.constant 0 : index
    %24 = vector.load %arg2[%c2_20, %c0_21, %c0_22] : memref<9x16x4xbf16, #tpu.memory_space<vmem>>, vector<1x16x4xbf16>
    %25 = vector.shape_cast %24 : vector<1x16x4xbf16> to vector<16x4xbf16>
    %cst_23 = arith.constant dense<0.000000e+00> : vector<16x256xf32>
    %26 = tpu.matmul %25, %23, %cst_23 {dimension_numbers = #tpu.dot_dimension_numbers<[1], [0], [0], [1], [0, 0, 1, 1], [], []>} : vector<16x4xbf16>, vector<4x256xbf16>, vector<16x256xf32> -> vector<16x256xf32>
    %27 = arith.addf %18, %26 : vector<16x256xf32>
    %c0_24 = arith.constant 0 : index
    %c0_25 = arith.constant 0 : index
    %c16 = arith.constant 16 : index
    %28 = vector.load %arg1[%c0_24, %c0_25, %c16] : memref<1x4x384xbf16, #tpu.memory_space<vmem>>, vector<1x4x256xbf16>
    %29 = vector.shape_cast %28 : vector<1x4x256xbf16> to vector<4x256xbf16>
    %c0_26 = arith.constant 0 : index
    %c0_27 = arith.constant 0 : index
    %30 = vector.load %arg3[%c0_26, %c0_27] : memref<8x256xbf16, #tpu.memory_space<vmem>>, vector<1x256xbf16>
    %31 = vector.broadcast %30 : vector<1x256xbf16> to vector<4x256xbf16>
    %32 = arith.mulf %29, %31 : vector<4x256xbf16>
    %c3 = arith.constant 3 : index
    %c0_28 = arith.constant 0 : index
    %c0_29 = arith.constant 0 : index
    %33 = vector.load %arg2[%c3, %c0_28, %c0_29] : memref<9x16x4xbf16, #tpu.memory_space<vmem>>, vector<1x16x4xbf16>
    %34 = vector.shape_cast %33 : vector<1x16x4xbf16> to vector<16x4xbf16>
    %cst_30 = arith.constant dense<0.000000e+00> : vector<16x256xf32>
    %35 = tpu.matmul %34, %32, %cst_30 {dimension_numbers = #tpu.dot_dimension_numbers<[1], [0], [0], [1], [0, 0, 1, 1], [], []>} : vector<16x4xbf16>, vector<4x256xbf16>, vector<16x256xf32> -> vector<16x256xf32>
    %36 = arith.addf %27, %35 : vector<16x256xf32>
    %c0_31 = arith.constant 0 : index
    %c0_32 = arith.constant 0 : index
    %c17 = arith.constant 17 : index
    %37 = vector.load %arg1[%c0_31, %c0_32, %c17] : memref<1x4x384xbf16, #tpu.memory_space<vmem>>, vector<1x4x256xbf16>
    %38 = vector.shape_cast %37 : vector<1x4x256xbf16> to vector<4x256xbf16>
    %c1_33 = arith.constant 1 : index
    %c0_34 = arith.constant 0 : index
    %39 = vector.load %arg3[%c1_33, %c0_34] : memref<8x256xbf16, #tpu.memory_space<vmem>>, vector<1x256xbf16>
    %40 = vector.broadcast %39 : vector<1x256xbf16> to vector<4x256xbf16>
    %41 = arith.mulf %38, %40 : vector<4x256xbf16>
    %c4 = arith.constant 4 : index
    %c0_35 = arith.constant 0 : index
    %c0_36 = arith.constant 0 : index
    %42 = vector.load %arg2[%c4, %c0_35, %c0_36] : memref<9x16x4xbf16, #tpu.memory_space<vmem>>, vector<1x16x4xbf16>
    %43 = vector.shape_cast %42 : vector<1x16x4xbf16> to vector<16x4xbf16>
    %cst_37 = arith.constant dense<0.000000e+00> : vector<16x256xf32>
    %44 = tpu.matmul %43, %41, %cst_37 {dimension_numbers = #tpu.dot_dimension_numbers<[1], [0], [0], [1], [0, 0, 1, 1], [], []>} : vector<16x4xbf16>, vector<4x256xbf16>, vector<16x256xf32> -> vector<16x256xf32>
    %45 = arith.addf %36, %44 : vector<16x256xf32>
    %c0_38 = arith.constant 0 : index
    %c0_39 = arith.constant 0 : index
    %c18 = arith.constant 18 : index
    %46 = vector.load %arg1[%c0_38, %c0_39, %c18] : memref<1x4x384xbf16, #tpu.memory_space<vmem>>, vector<1x4x256xbf16>
    %47 = vector.shape_cast %46 : vector<1x4x256xbf16> to vector<4x256xbf16>
    %c2_40 = arith.constant 2 : index
    %c0_41 = arith.constant 0 : index
    %48 = vector.load %arg3[%c2_40, %c0_41] : memref<8x256xbf16, #tpu.memory_space<vmem>>, vector<1x256xbf16>
    %49 = vector.broadcast %48 : vector<1x256xbf16> to vector<4x256xbf16>
    %50 = arith.mulf %47, %49 : vector<4x256xbf16>
    %c5 = arith.constant 5 : index
    %c0_42 = arith.constant 0 : index
    %c0_43 = arith.constant 0 : index
    %51 = vector.load %arg2[%c5, %c0_42, %c0_43] : memref<9x16x4xbf16, #tpu.memory_space<vmem>>, vector<1x16x4xbf16>
    %52 = vector.shape_cast %51 : vector<1x16x4xbf16> to vector<16x4xbf16>
    %cst_44 = arith.constant dense<0.000000e+00> : vector<16x256xf32>
    %53 = tpu.matmul %52, %50, %cst_44 {dimension_numbers = #tpu.dot_dimension_numbers<[1], [0], [0], [1], [0, 0, 1, 1], [], []>} : vector<16x4xbf16>, vector<4x256xbf16>, vector<16x256xf32> -> vector<16x256xf32>
    %54 = arith.addf %45, %53 : vector<16x256xf32>
    %c0_45 = arith.constant 0 : index
    %c0_46 = arith.constant 0 : index
    %c32 = arith.constant 32 : index
    %55 = vector.load %arg1[%c0_45, %c0_46, %c32] : memref<1x4x384xbf16, #tpu.memory_space<vmem>>, vector<1x4x256xbf16>
    %56 = vector.shape_cast %55 : vector<1x4x256xbf16> to vector<4x256xbf16>
    %c0_47 = arith.constant 0 : index
    %c0_48 = arith.constant 0 : index
    %57 = vector.load %arg3[%c0_47, %c0_48] : memref<8x256xbf16, #tpu.memory_space<vmem>>, vector<1x256xbf16>
    %58 = vector.broadcast %57 : vector<1x256xbf16> to vector<4x256xbf16>
    %59 = arith.mulf %56, %58 : vector<4x256xbf16>
    %c6 = arith.constant 6 : index
    %c0_49 = arith.constant 0 : index
    %c0_50 = arith.constant 0 : index
    %60 = vector.load %arg2[%c6, %c0_49, %c0_50] : memref<9x16x4xbf16, #tpu.memory_space<vmem>>, vector<1x16x4xbf16>
    %61 = vector.shape_cast %60 : vector<1x16x4xbf16> to vector<16x4xbf16>
    %cst_51 = arith.constant dense<0.000000e+00> : vector<16x256xf32>
    %62 = tpu.matmul %61, %59, %cst_51 {dimension_numbers = #tpu.dot_dimension_numbers<[1], [0], [0], [1], [0, 0, 1, 1], [], []>} : vector<16x4xbf16>, vector<4x256xbf16>, vector<16x256xf32> -> vector<16x256xf32>
    %63 = arith.addf %54, %62 : vector<16x256xf32>
    %c0_52 = arith.constant 0 : index
    %c0_53 = arith.constant 0 : index
    %c33 = arith.constant 33 : index
    %64 = vector.load %arg1[%c0_52, %c0_53, %c33] : memref<1x4x384xbf16, #tpu.memory_space<vmem>>, vector<1x4x256xbf16>
    %65 = vector.shape_cast %64 : vector<1x4x256xbf16> to vector<4x256xbf16>
    %c1_54 = arith.constant 1 : index
    %c0_55 = arith.constant 0 : index
    %66 = vector.load %arg3[%c1_54, %c0_55] : memref<8x256xbf16, #tpu.memory_space<vmem>>, vector<1x256xbf16>
    %67 = vector.broadcast %66 : vector<1x256xbf16> to vector<4x256xbf16>
    %68 = arith.mulf %65, %67 : vector<4x256xbf16>
    %c7 = arith.constant 7 : index
    %c0_56 = arith.constant 0 : index
    %c0_57 = arith.constant 0 : index
    %69 = vector.load %arg2[%c7, %c0_56, %c0_57] : memref<9x16x4xbf16, #tpu.memory_space<vmem>>, vector<1x16x4xbf16>
    %70 = vector.shape_cast %69 : vector<1x16x4xbf16> to vector<16x4xbf16>
    %cst_58 = arith.constant dense<0.000000e+00> : vector<16x256xf32>
    %71 = tpu.matmul %70, %68, %cst_58 {dimension_numbers = #tpu.dot_dimension_numbers<[1], [0], [0], [1], [0, 0, 1, 1], [], []>} : vector<16x4xbf16>, vector<4x256xbf16>, vector<16x256xf32> -> vector<16x256xf32>
    %72 = arith.addf %63, %71 : vector<16x256xf32>
    %c0_59 = arith.constant 0 : index
    %c0_60 = arith.constant 0 : index
    %c34 = arith.constant 34 : index
    %73 = vector.load %arg1[%c0_59, %c0_60, %c34] : memref<1x4x384xbf16, #tpu.memory_space<vmem>>, vector<1x4x256xbf16>
    %74 = vector.shape_cast %73 : vector<1x4x256xbf16> to vector<4x256xbf16>
    %c2_61 = arith.constant 2 : index
    %c0_62 = arith.constant 0 : index
    %75 = vector.load %arg3[%c2_61, %c0_62] : memref<8x256xbf16, #tpu.memory_space<vmem>>, vector<1x256xbf16>
    %76 = vector.broadcast %75 : vector<1x256xbf16> to vector<4x256xbf16>
    %77 = arith.mulf %74, %76 : vector<4x256xbf16>
    %c8 = arith.constant 8 : index
    %c0_63 = arith.constant 0 : index
    %c0_64 = arith.constant 0 : index
    %78 = vector.load %arg2[%c8, %c0_63, %c0_64] : memref<9x16x4xbf16, #tpu.memory_space<vmem>>, vector<1x16x4xbf16>
    %79 = vector.shape_cast %78 : vector<1x16x4xbf16> to vector<16x4xbf16>
    %cst_65 = arith.constant dense<0.000000e+00> : vector<16x256xf32>
    %80 = tpu.matmul %79, %77, %cst_65 {dimension_numbers = #tpu.dot_dimension_numbers<[1], [0], [0], [1], [0, 0, 1, 1], [], []>} : vector<16x4xbf16>, vector<4x256xbf16>, vector<16x256xf32> -> vector<16x256xf32>
    %81 = arith.addf %72, %80 : vector<16x256xf32>
    %82 = vector.shape_cast %81 : vector<16x256xf32> to vector<1x16x256xf32>
    %cst_66 = arith.constant dense<0.000000e+00> : vector<1xf32>
    %83 = vector.multi_reduction <add>, %82, %cst_66 [1, 2] : vector<1x16x256xf32> to vector<1xf32>
    %84 = vector.shape_cast %83 : vector<1xf32> to vector<1x1x1xf32>
    %85 = vector.extract %84[0, 0, 0] : f32 from vector<1x1x1xf32>
    %cst_67 = arith.constant 4.8828125E-4 : f32
    %86 = arith.mulf %85, %cst_67 : f32
    %87 = vector.broadcast %86 : f32 to vector<16x256xf32>
    %88 = arith.subf %81, %87 : vector<16x256xf32>
    %89 = vector.broadcast %86 : f32 to vector<16x256xf32>
    %90 = arith.subf %81, %89 : vector<16x256xf32>
    %91 = arith.mulf %88, %90 : vector<16x256xf32>
    %92 = vector.shape_cast %91 : vector<16x256xf32> to vector<1x16x256xf32>
    %cst_68 = arith.constant dense<0.000000e+00> : vector<1xf32>
    %93 = vector.multi_reduction <add>, %92, %cst_68 [1, 2] : vector<1x16x256xf32> to vector<1xf32>
    %94 = vector.shape_cast %93 : vector<1xf32> to vector<1x1x1xf32>
    %95 = vector.extract %94[0, 0, 0] : f32 from vector<1x1x1xf32>
    %cst_69 = arith.constant 2.048000e+03 : f32
    %96 = arith.mulf %cst_69, %86 : f32
    %97 = arith.mulf %96, %86 : f32
    %98 = arith.subf %95, %97 : f32
    %cst_70 = arith.constant 4.8828125E-4 : f32
    %99 = arith.mulf %98, %cst_70 : f32
    %cst_71 = arith.constant 9.99999974E-6 : f32
    %100 = arith.addf %99, %cst_71 : f32
    %101 = math.rsqrt %100 : f32
    %c0_72 = arith.constant 0 : index
    %c0_73 = arith.constant 0 : index
    %102 = vector.load %arg4[%c0_72, %c0_73] : memref<16x1xf32, #tpu.memory_space<vmem>>, vector<16x1xf32>
    %103 = vector.broadcast %101 : f32 to vector<16x1xf32>
    %104 = arith.mulf %102, %103 : vector<16x1xf32>
    %c0_74 = arith.constant 0 : index
    %c0_75 = arith.constant 0 : index
    %105 = vector.load %arg5[%c0_74, %c0_75] : memref<16x1xf32, #tpu.memory_space<vmem>>, vector<16x1xf32>
    %106 = vector.broadcast %86 : f32 to vector<16x1xf32>
    %107 = arith.mulf %106, %104 : vector<16x1xf32>
    %108 = arith.subf %105, %107 : vector<16x1xf32>
    %109 = vector.broadcast %104 : vector<16x1xf32> to vector<16x256xf32>
    %110 = arith.mulf %81, %109 : vector<16x256xf32>
    %111 = vector.broadcast %108 : vector<16x1xf32> to vector<16x256xf32>
    %112 = arith.addf %110, %111 : vector<16x256xf32>
    %cst_76 = arith.constant 0.000000e+00 : f32
    %113 = vector.broadcast %cst_76 : f32 to vector<16x256xf32>
    %114 = arith.maximumf %112, %113 : vector<16x256xf32>
    %c0_77 = arith.constant 0 : index
    %c0_78 = arith.constant 0 : index
    %c0_79 = arith.constant 0 : index
    %115 = vector.load %arg6[%c0_77, %c0_78, %c0_79] : memref<1x16x256xf32, #tpu.memory_space<vmem>>, vector<1x16x256xf32>
    %116 = vector.shape_cast %115 : vector<1x16x256xf32> to vector<16x256xf32>
    %117 = vector.shape_cast %114 : vector<16x256xf32> to vector<1x16x256xf32>
    tpu.vector_store %arg6[%c0_77, %c0_78, %c0_79], %117 {strides = array<i32>} : memref<1x16x256xf32, #tpu.memory_space<vmem>>, vector<1x16x256xf32>,
    return
  }
  func.func @transform_0(%arg0: i32) -> (i32, i32, i32) {
    %c0_i32 = arith.constant 0 : i32
    %c0_i32_0 = arith.constant 0 : i32
    %c0_i32_1 = arith.constant 0 : i32
    return %arg0, %c0_i32, %c0_i32_0 : i32, i32, i32
  }
  func.func @transform_1(%arg0: i32) -> (i32, i32, i32) {
    %c0_i32 = arith.constant 0 : i32
    %c0_i32_0 = arith.constant 0 : i32
    %c0_i32_1 = arith.constant 0 : i32
    %c0_i32_2 = arith.constant 0 : i32
    return %c0_i32, %c0_i32_0, %c0_i32_1 : i32, i32, i32
  }
  func.func @transform_2(%arg0: i32) -> (i32, i32) {
    %c0_i32 = arith.constant 0 : i32
    %c0_i32_0 = arith.constant 0 : i32
    %c0_i32_1 = arith.constant 0 : i32
    return %c0_i32, %c0_i32_0 : i32, i32
  }
  func.func @transform_3(%arg0: i32) -> (i32, i32) {
    %c0_i32 = arith.constant 0 : i32
    %c0_i32_0 = arith.constant 0 : i32
    %c0_i32_1 = arith.constant 0 : i32
    return %c0_i32, %c0_i32_0 : i32, i32
  }
  func.func @transform_4(%arg0: i32) -> (i32, i32) {
    %c0_i32 = arith.constant 0 : i32
    %c0_i32_0 = arith.constant 0 : i32
    %c0_i32_1 = arith.constant 0 : i32
    return %c0_i32, %c0_i32_0 : i32, i32
  }
  func.func @transform_5(%arg0: i32) -> (i32, i32, i32) {
    %c0_i32 = arith.constant 0 : i32
    %c0_i32_0 = arith.constant 0 : i32
    %c0_i32_1 = arith.constant 0 : i32
    return %arg0, %c0_i32, %c0_i32_0 : i32, i32, i32
  }
}

</mosaic_0001>

<bundles_post_ra>
// kernel: conv2d_block_forward.1
= control target key start
LH: loop header
LB: loop body
LE: loop exit
PB: predicated region body
PF: predicated region fallthrough
CT: control target
= control target key end

     0   :  { %s1373_s18 = smov 0   ;;  %s1537_s0 = inlined_call_operand.vmem [shape: bf16[2,4,384], index: 0, kind: input, shape index: {}]   ;;  %s1538_s1 = inlined_call_operand.vmem [shape: bf16[9,16,4], index: 1, kind: input, shape index: {}]   ;;  %s1539_s2 = inlined_call_operand.vmem [shape: bf16[8,256], index: 2, kind: input, shape index: {}]   ;;  %s1540_s3 = inlined_call_operand.vmem [shape: f32[16,1], index: 3, kind: input, shape index: {}]   ;;  %s1541_s4 = inlined_call_operand.vmem [shape: f32[16,1], index: 4, kind: input, shape index: {}]   ;;  %s1542_s5 = inlined_call_operand.vmem [shape: f32[2,16,256], index: 5, kind: output, shape index: {}]  }
   0x1 LB: > { %s1192_s19 = sadd.s32 4294967295, %s1324_s18   ;;  %p1196_p0 = scmp.ge.s32.totalorder %s1324_s18, 1  ;;  %s1324_s18 = sphi %s1373_s18, %s15_s18  }
   0x2   : > { %p187_p1 = scmp.lt.s32.totalorder %s1324_s18, 3 }
   0x4   : > { %p188_p2 = pnand %p1196_p0, %p187_p1 }
   0x5   : > { %p215_p3 = scmp.lt.s32.totalorder (!%p188_p2), %s1192_s19, 1  ;;  %s1326_s30 = smov (!%p188_p2), 18  }
   0x6   : > { %191 = sbr.rel (%p188_p2) target bundleno = 1156 (0x484), region = 40  ;;  %s1327_s6 = smov (!%p188_p2), 16  }
   0x7   : > { %s1328_s7 = smov (!%p188_p2), 1   ;;  %s1329_s8 = smov (!%p188_p2), 32  }
   0x8   : > { %s1330_s9 = smov (!%p188_p2), 17   ;;  %s1331_s10 = smov (!%p188_p2), 2  }
   0x9   : > { %s1332_s11 = smov (!%p188_p2), 127   ;;  %s1333_s12 = smov (!%p188_p2), 33  }
   0xa   : > { %s1334_s13 = smov (!%p188_p2), 34   ;;  %s1335_s14 = smov (!%p188_p2), 126  }
   0xb   : > { %v262_v0 = vld [vmem:[%s1539_s2] sm:$0x11]  ;;  %v411_v1 = vld [vmem:[%s1539_s2] sm:$0x22]  ;;  %s1544_s19 = smov (!%p215_p3, %s1192_s19), 1  ;;  %vm247_vm0 = vcmask 1043456  }
   0xc   : > { %v264_v2 = vunpack.c.l.b16 %v262_v0  ;;  %v265_v3 = vunpack.c.h.b16 %v262_v0  ;;  %v413_v4 = vunpack.c.l.b16 %v411_v1  ;;  %v414_v5 = vunpack.c.h.b16 %v411_v1  ;;  %v227_v6 = vld [vmem:[%s1539_s2] sm:$0x11]  ;;  %s1282_s26 = smul.u32 6, %s1544_s19  ;;  %s1336_s15 = smov 112  }
   0xd   : > { %v229_v7 = vunpack.c.l.b16 %v227_v6  ;;  %v230_v8 = vunpack.c.h.b16 %v227_v6  ;;  %vm289_vm1 = vcmask 7168   ;;  %vm436_vm2 = vcmask 15360   ;;  %s1337_s16 = smov 111   ;;  %s1338_s17 = smov 110  }
   0xe   : > { %v266_v9 = vpack.c.b16 %v264_v2, %v264_v2  ;;  %v267_v10 = vpack.c.b16 %v265_v3, %v265_v3  ;;  %v415_v11 = vpack.c.b16 %v413_v4, %v413_v4  ;;  %v416_v12 = vpack.c.b16 %v414_v5, %v414_v5  ;;  %s1396_s29 = scalar_lea.vmem %s1537_s0, %s1282_s26  ;;  %s1339_s20 = smov 96  }
   0xf   : > { %v231_v13 = vpack.c.b16 %v229_v7, %v229_v7  ;;  %v232_v14 = vpack.c.b16 %v230_v8, %v230_v8  ;;  %v226_v31 = vld [vmem:[%s1396_s29] sm:$0xf]  ;;  %vm523_vm3 = vcmask 130048   ;;  %vm610_vm4 = vcmask 138240   ;;  %s1340_s27 = smov 95  }
  0x10   : > { %v269_v15 = vshrl.u32 %v266_v9, 16  ;;  %v274_v16 = vshrl.u32 %v267_v10, 16  ;;  %v418_v17 = vpack.i.b16 %v415_v11, %v415_v11  ;;  %v422_v18 = vpack.i.b16 %v416_v12, %v416_v12  ;;  %v261_v44 = vld [vmem:[%s1396_s29] sm:$0x3f] }
  0x11   : > { %v234_v19 = vpack.i.b16 %v231_v13, %v231_v13  ;;  %v238_v20 = vpack.i.b16 %v232_v14, %v232_v14  ;;  %v241_v37 = vunpack.c.l.bf16 %v226_v31  ;;  %v279_v45 = vunpack.c.h.bf16 %v261_v44  ;;  %v410_v54 = vld [vmem:[%s1396_s29] sm:$0x3f] }
  0x12   : > { %v270_v21 = vpack.i.b16 %v269_v15, %v269_v15  ;;  %v275_v22 = vpack.i.b16 %v274_v16, %v274_v16  ;;  %v420_v23 = vperm.slane %v418_v17, 1  ;;  %v424_v24 = vperm.slane %v422_v18, 1  ;;  %v517_v62 = vld [vmem:[%s1396_s29] sm:$0x3f] }
  0x13   : > { %v236_v25 = vperm.slane %v234_v19, 0  ;;  %v240_v26 = vperm.slane %v238_v20, 0  ;;  %v278_v47 = vunpack.c.l.bf16 %v261_v44  ;;  %v426_v56 = vunpack.c.h.bf16 %v410_v54  ;;  %v604_v13 = vld [vmem:[%s1396_s29] sm:$0x3f] }
  0x14   : > { %v272_v27 = vperm.slane %v270_v21, 0  ;;  %v277_v28 = vperm.slane %v275_v22, 0  ;;  %v427_v29 = vunpack.c.l.bf16 %v420_v23  ;;  %v428_v30 = vunpack.c.l.bf16 %v424_v24  ;;  %v691_v24 = vld [vmem:[%s1396_s29] sm:$0x3f] }
  0x15   : > { %v242_v32 = vunpack.c.l.bf16 %v236_v25  ;;  %v243_v33 = vunpack.c.l.bf16 %v240_v26  ;;  %v425_v58 = vunpack.c.l.bf16 %v410_v54  ;;  %v518_v7 = vunpack.c.l.bf16 %v517_v62  ;;  %v778_v44 = vld [vmem:[%s1396_s29] sm:$0x3f] }
  0x16   : > { %v280_v34 = vunpack.c.l.bf16 %v272_v27  ;;  %v281_v35 = vunpack.c.l.bf16 %v277_v28  ;;  %v431_v36 = vrot.slane %v428_v30, 4  ;;  %v519_v8 = vunpack.c.h.bf16 %v517_v62 }
  0x17   : > { %v246_v38 = vrot.slane %v243_v33, 4  ;;  %v605_v18 = vunpack.c.l.bf16 %v604_v13  ;;  %v606_v19 = vunpack.c.h.bf16 %v604_v13  ;;  %vm697_vm5 = vcmask 146432  }
  0x18   : > { %v284_v39 = vrot.slane %v281_v35, 4  ;;  %v1399_v40 = vsel %vm247_vm0, %v427_v29, %v431_v36  ;;  %v692_v30 = vunpack.c.l.bf16 %v691_v24  ;;  %vm784_vm6 = vcmask 261120  }
  0x19   : > { %v248_v41 = vsel %vm247_vm0, %v242_v32, %v246_v38  ;;  %694 = vrot.lane.b32.xlu2 %v1399_v40, %s1326_s30  ;;  %v693_v32 = vunpack.c.h.bf16 %v691_v24  ;;  %vm326_vm7 = vcmask 1039360   ;;  %vm333_vm8 = vcmask 1041408   ;;  %s1341_s30 = smov 94  }
  0x1a   : > { %v1402_v42 = vsel %vm247_vm0, %v280_v34, %v284_v39  ;;  %520 = vrot.lane.b32.xlu1 %v248_v41, %s1327_s6  ;;  %v250_v43 = vmul.f32 %v248_v41, %v241_v37  ;;  %vm329_vm9 = vcmask 31744   ;;  %vm871_vm10 = vcmask 269312  }
  0x1b   : > { %286 = vrot.lane.b32.xlu0 %v1402_v42, %s1328_s7  ;;  %vm958_vm11 = vcmask 277504   ;;  %vm473_vm12 = vcmask 1031168   ;;  %vm560_vm13 = vcmask 916480   ;;  %vm647_vm14 = vcmask 908288  }
  0x1c   : > { %252 = vst [vmem:[#allocation1] ss:$2 sm:$0xff] %v250_v43  ;;  %vm734_vm15 = vcmask 900096   ;;  %vm821_vm0 = vcmask 785408  }
  0x21   : > { %781 = vrot.lane.b32.xlu2 %v248_v41, %s1329_s8 }
  0x22   : > { %607 = vrot.lane.b32.xlu1 %v1402_v42, %s1330_s9 }
  0x23   : > { %433 = vrot.lane.b32.xlu0 %v1399_v40, %s1331_s10  ;;  %v1408_v49 = vld.sshfl [vmem:[#allocation1] sm:$0xff pattern:$0x75316420]  ;;  %v1410_v50 = vld.sshfl [vmem:[#allocation1 + $0x8] sm:$0xff pattern:$0x75316420] }
  0x24   : > { %v258_v13 = vpack.c.bf16 %v1410_v50, %v1410_v50  ;;  %s1272_s10 = sshll.u32 %s1544_s19, 5 }
  0x73   : > { %v695_v21 = vpop.permute.xlu2 %694 }
  0x74   : > { %v696_v25 = vrot.slane %v695_v21, 4 }
  0x76   : > { %v698_v33 = vsel %vm697_vm5, %v696_v25, %v695_v21  ;;  %v702_v35 = vmul.f32 %v696_v25, %v693_v32  ;;  %v952_v21 = vld [vmem:[%s1396_s29] sm:$0x3f] }
  0x77   : > { %v701_v34 = vmul.f32 %v698_v33, %v692_v30  ;;  %v954_v25 = vunpack.c.h.bf16 %v952_v21 }
  0x7b   : > { %v782_v41 = vpop.permute.xlu2 %781 }
  0x8c   : > { %v521_v55 = vpop.permute.xlu1 %520 }
  0x8d   : > { %v287_v46 = vpop.permute.xlu0 %286  ;;  %v522_v63 = vrot.slane %v521_v55, 4 }
  0x8e   : > { %v288_v48 = vrot.slane %v287_v46, 4 }
  0x8f   : > { %v524_v9 = vsel %vm523_vm3, %v522_v63, %v521_v55  ;;  %v528_v12 = vmul.f32 %v522_v63, %v519_v8 }
  0x90   : > { %v290_v51 = vsel %vm289_vm1, %v288_v48, %v287_v46  ;;  %v294_v52 = vmul.f32 %v288_v48, %v279_v45  ;;  %v527_v11 = vmul.f32 %v524_v9, %v518_v7  ;;  %v783_v45 = vrot.slane %v782_v41, 4 }
  0x91   : > { %v293_v53 = vmul.f32 %v290_v51, %v278_v47  ;;  %v779_v46 = vunpack.c.l.bf16 %v778_v44  ;;  %v780_v48 = vunpack.c.h.bf16 %v778_v44  ;;  %v257_v9 = vpack.c.bf16 %v1408_v49, %v1408_v49  ;;  %v1273_v49 = vld [vmem:[%s1538_s1] sm:$0xff] }
  0x92   : > { %299 = vst [vmem:[#allocation1 + $0x10] ss:$2 sm:$0xff] %v294_v52  ;;  %v785_v47 = vsel %vm784_vm6, %v783_v45, %v782_v41  ;;  %vm908_vm1 = vcmask 777216  }
  0x93   : > { %297 = vst [vmem:[#allocation1] ss:$2 sm:$0xff] %v293_v53  ;;  %v788_v51 = vmul.f32 %v785_v47, %v779_v46  ;;  %v789_v52 = vmul.f32 %v783_v45, %v780_v48 }
  0x94   : > { %v608_v10 = vpop.permute.xlu1 %607 }
  0x95   : > { %v434_v57 = vpop.permute.xlu0 %433  ;;  %v609_v14 = vrot.slane %v608_v10, 4 }
  0x96   : > { %v435_v59 = vrot.slane %v434_v57, 4 }
  0x97   : > { %v611_v20 = vsel %vm610_vm4, %v609_v14, %v608_v10  ;;  %v615_v23 = vmul.f32 %v609_v14, %v606_v19  ;;  %v377_v14 = vsel %vm333_vm8, %v257_v9, 0 }
  0x98   : > { %v437_v60 = vsel %vm436_vm2, %v435_v59, %v434_v57  ;;  %v441_v61 = vmul.f32 %v435_v59, %v426_v56  ;;  %v614_v22 = vmul.f32 %v611_v20, %v605_v18  ;;  %389 = vmatpush.bf16.msra.mxu2 %v377_v14  ;;  %vm995_vm2 = vcmask 769024  }
  0x99   : > { %v302_v0 = vld.sshfl [vmem:[#allocation1 + $0x10] sm:$0xff pattern:$0x75316420]  ;;  %v440_v1 = vmul.f32 %v437_v60, %v425_v58 }
  0x9a   : > { %v308_v2 = vpack.c.bf16 %v302_v0, %v302_v0  ;;  %v301_v3 = vld.sshfl [vmem:[#allocation1 + $0x8] sm:$0xff pattern:$0x75316420]  ;;  %v300_v4 = vld.sshfl [vmem:[#allocation1] sm:$0xff pattern:$0x75316420] }
  0x9b   : > { %v307_v5 = vpack.c.bf16 %v301_v3, %v301_v3  ;;  %v306_v6 = vpack.c.bf16 %v300_v4, %v300_v4  ;;  %444 = vst [vmem:[#allocation1] ss:$2 sm:$0xff] %v440_v1  ;;  %1212 = vmatmul.msk.bf16.vlgmr.msra.gmra.mxu2 %vm329_vm9, %v1273_v49 }
  0x9c   : > { %324 = vrot.lane.b32.xlu2 %v308_v2, %s1332_s11  ;;  %446 = vst [vmem:[#allocation1 + $0x10] ss:$2 sm:$0xff] %v441_v61 }
  0x9d   : > { %322 = vrot.lane.b32.xlu1 %v307_v5, %s1332_s11  ;;  %320 = vrot.lane.b32.xlu0 %v306_v6, %s1332_s11 }
  0xa2   : > { %v1415_v15 = vld.sshfl [vmem:[#allocation1] sm:$0xff pattern:$0x75316420]  ;;  %v448_v16 = vld.sshfl [vmem:[#allocation1 + $0x8] sm:$0xff pattern:$0x75316420] }
  0xa3   : > { %v449_v17 = vld.sshfl [vmem:[#allocation1 + $0x10] sm:$0xff pattern:$0x75316420]  ;;  %531 = vst [vmem:[#allocation1] ss:$2 sm:$0xff] %v527_v11  ;;  %v454_v26 = vpack.c.bf16 %v448_v16, %v448_v16  ;;  %v453_v55 = vpack.c.bf16 %v1415_v15, %v1415_v15  ;;  %v380_v16 = vsel %vm333_vm8, %v258_v13, 0 }
  0xa4   : > { %533 = vst [vmem:[#allocation1 + $0x10] ss:$2 sm:$0xff] %v528_v12  ;;  %v455_v27 = vpack.c.bf16 %v449_v17, %v449_v17  ;;  %v1274_v12 = vld [vmem:[%s1538_s1 + $0x8] sm:$0xff]  ;;  %v865_v15 = vld [vmem:[%s1396_s29] sm:$0x3f]  ;;  %403 = vmatpush.bf16.msra.mxu3 %v380_v16 }
  0xa5   : > { %868 = vrot.lane.b32.xlu0 %v1402_v42, %s1333_s12  ;;  %955 = vrot.lane.b32.xlu1 %v1399_v40, %s1334_s13  ;;  %v867_v50 = vunpack.c.h.bf16 %v865_v15  ;;  %v866_v17 = vunpack.c.l.bf16 %v865_v15  ;;  %s224_s13 = scalar_lea.vmem %s1542_s5, %s1272_s10 }
  0xa6   : > { %467 = vrot.lane.b32.xlu2 %v453_v55, %s1335_s14 }
  0xa7   : > { %1213 = vmatmul.msk.bf16.vlgmr.msra.gmra.mxu3 %vm329_vm9, %v1273_v49 }
  0xaa   : > { %v534_v28 = vld.sshfl [vmem:[#allocation1] sm:$0xff pattern:$0x75316420]  ;;  %v535_v29 = vld.sshfl [vmem:[#allocation1 + $0x8] sm:$0xff pattern:$0x75316420] }
  0xab   : > { %618 = vst [vmem:[#allocation1] ss:$2 sm:$0xff] %v614_v22  ;;  %v536_v31 = vld.sshfl [vmem:[#allocation1 + $0x10] sm:$0xff pattern:$0x75316420]  ;;  %v541_v36 = vpack.c.bf16 %v535_v29, %v535_v29  ;;  %v540_v60 = vpack.c.bf16 %v534_v28, %v534_v28  ;;  %v953_v29 = vunpack.c.l.bf16 %v952_v21 }
  0xac   : > { %620 = vst [vmem:[#allocation1 + $0x10] ss:$2 sm:$0xff] %v615_v23  ;;  %v542_v37 = vpack.c.bf16 %v536_v31, %v536_v31 }
  0xad   : > { %469 = vrot.lane.b32.xlu0 %v454_v26, %s1335_s14  ;;  %471 = vrot.lane.b32.xlu1 %v455_v27, %s1335_s14 }
  0xae   : > { %554 = vrot.lane.b32.xlu2 %v540_v60, %s1336_s15 }
  0xb2   : > { %v621_v38 = vld.sshfl [vmem:[#allocation1] sm:$0xff pattern:$0x75316420]  ;;  %v622_v39 = vld.sshfl [vmem:[#allocation1 + $0x8] sm:$0xff pattern:$0x75316420] }
  0xb3   : > { %705 = vst [vmem:[#allocation1] ss:$2 sm:$0xff] %v701_v34  ;;  %v623_v40 = vld.sshfl [vmem:[#allocation1 + $0x10] sm:$0xff pattern:$0x75316420]  ;;  %v628_v42 = vpack.c.bf16 %v622_v39, %v622_v39  ;;  %v627_v0 = vpack.c.bf16 %v621_v38, %v621_v38 }
  0xb4   : > { %707 = vst [vmem:[#allocation1 + $0x10] ss:$2 sm:$0xff] %v702_v35  ;;  %v629_v43 = vpack.c.bf16 %v623_v40, %v623_v40 }
  0xb5   : > { %556 = vrot.lane.b32.xlu0 %v541_v36, %s1336_s15  ;;  %558 = vrot.lane.b32.xlu1 %v542_v37, %s1336_s15  ;;  %v1275_v36 = vld [vmem:[%s1538_s1 + $0x10] sm:$0xff] }
  0xb6   : > { %641 = vrot.lane.b32.xlu2 %v627_v0, %s1337_s16 }
  0xba   : > { %v708_v53 = vld.sshfl [vmem:[#allocation1] sm:$0xff pattern:$0x75316420]  ;;  %v709_v54 = vld.sshfl [vmem:[#allocation1 + $0x8] sm:$0xff pattern:$0x75316420] }
  0xbb   : > { %v715_v56 = vpack.c.bf16 %v709_v54, %v709_v54  ;;  %792 = vst [vmem:[#allocation1] ss:$2 sm:$0xff] %v788_v51  ;;  %v710_v57 = vld.sshfl [vmem:[#allocation1 + $0x10] sm:$0xff pattern:$0x75316420]  ;;  %v714_v1 = vpack.c.bf16 %v708_v53, %v708_v53  ;;  %v1276_v53 = vld [vmem:[%s1538_s1 + $0x18] sm:$0xff] }
  0xbc   : > { %v716_v58 = vpack.c.bf16 %v710_v57, %v710_v57  ;;  %794 = vst [vmem:[#allocation1 + $0x10] ss:$2 sm:$0xff] %v789_v52 }
  0xbd   : > { %643 = vrot.lane.b32.xlu0 %v628_v42, %s1337_s16  ;;  %645 = vrot.lane.b32.xlu1 %v629_v43, %s1337_s16 }
  0xbe   : > { %728 = vrot.lane.b32.xlu2 %v714_v1, %s1338_s17 }
  0xc2   : > { %v796_v59 = vld.sshfl [vmem:[#allocation1 + $0x8] sm:$0xff pattern:$0x75316420]  ;;  %v795_v2 = vld.sshfl [vmem:[#allocation1] sm:$0xff pattern:$0x75316420] }
  0xc3   : > { %v802_v61 = vpack.c.bf16 %v796_v59, %v796_v59  ;;  %v797_v62 = vld.sshfl [vmem:[#allocation1 + $0x10] sm:$0xff pattern:$0x75316420]  ;;  %v801_v3 = vpack.c.bf16 %v795_v2, %v795_v2  ;;  %v1277_v2 = vld [vmem:[%s1538_s1 + $0x20] sm:$0xff] }
  0xc4   : > { %v803_v63 = vpack.c.bf16 %v797_v62, %v797_v62 }
  0xc5   : > { %730 = vrot.lane.b32.xlu0 %v715_v56, %s1338_s17  ;;  %732 = vrot.lane.b32.xlu1 %v716_v58, %s1338_s17 }
  0xc6   : > { %815 = vrot.lane.b32.xlu2 %v801_v3, %s1339_s20 }
  0xcd   : > { %817 = vrot.lane.b32.xlu0 %v802_v61, %s1339_s20  ;;  %819 = vrot.lane.b32.xlu1 %v803_v63, %s1339_s20 }
  0xf6   : > { %v325_v4 = vpop.permute.xlu2 %324 }
 0x100   : > { %v468_v35 = vpop.permute.xlu2 %467 }
 0x108   : > { %v555_v52 = vpop.permute.xlu2 %554 }
 0x10f   : > { %v323_v5 = vpop.permute.xlu1 %322  ;;  %v321_v6 = vpop.permute.xlu0 %320 }
 0x110   : > { %v327_v7 = vsel %vm326_vm7, %v321_v6, %v323_v5  ;;  %v328_v8 = vsel %vm326_vm7, %v323_v5, %v325_v4  ;;  %v642_v1 = vpop.permute.xlu2 %641 }
 0x111   : > { %v335_v10 = vsel %vm333_vm8, %v327_v7, 0  ;;  %v338_v11 = vsel %vm333_vm8, %v328_v8, 0 }
 0x112   : > { %347 = vmatpush.bf16.msra.mxu0 %v335_v10  ;;  %361 = vmatpush.bf16.msra.mxu1 %v338_v11  ;;  %v1278_v11 = vld [vmem:[%s1538_s1 + $0x28] sm:$0xff] }
 0x115   : > { %1206 = vmatmul.msk.bf16.vlgmr.msra.gmra.mxu0 %vm329_vm9, %v1274_v12  ;;  %1207 = vmatmul.msk.bf16.vlgmr.msra.gmra.mxu1 %vm329_vm9, %v1274_v12 }
 0x117   : > { %v869_v18 = vpop.permute.xlu0 %868  ;;  %v956_v19 = vpop.permute.xlu1 %955 }
 0x118   : > { %v870_v20 = vrot.slane %v869_v18, 4  ;;  %v957_v26 = vrot.slane %v956_v19, 4  ;;  %v729_v5 = vpop.permute.xlu2 %728 }
 0x11a   : > { %v872_v22 = vsel %vm871_vm10, %v870_v20, %v869_v18  ;;  %v876_v23 = vmul.f32 %v870_v20, %v867_v50  ;;  %v963_v30 = vmul.f32 %v957_v26, %v954_v25  ;;  %v959_v32 = vsel %vm958_vm11, %v957_v26, %v956_v19  ;;  %v1279_v50 = vld [vmem:[%s1538_s1 + $0x30] sm:$0xff]  ;;  %v1280_v26 = vld [vmem:[%s1538_s1 + $0x38] sm:$0xff] }
 0x11b   : > { %v875_v24 = vmul.f32 %v872_v22, %v866_v17  ;;  %v962_v37 = vmul.f32 %v959_v32, %v953_v29 }
 0x11c   : > { %881 = vst [vmem:[#allocation1 + $0x10] ss:$2 sm:$0xff] %v876_v23 }
 0x11d   : > { %879 = vst [vmem:[#allocation1] ss:$2 sm:$0xff] %v875_v24 }
 0x11f   : > { %v470_v27 = vpop.permute.xlu0 %469  ;;  %v472_v28 = vpop.permute.xlu1 %471 }
 0x120   : > { %v475_v31 = vsel %vm473_vm12, %v470_v27, %v472_v28  ;;  %v474_v40 = vsel %vm473_vm12, %v468_v35, %v470_v27  ;;  %v816_v13 = vpop.permute.xlu2 %815 }
 0x121   : > { %v483_v33 = vsel %vm333_vm8, %v475_v31, 0  ;;  %v480_v43 = vsel %vm333_vm8, %v474_v40, 0 }
 0x122   : > { %506 = vmatpush.bf16.msrb.mxu1 %v483_v33  ;;  %492 = vmatpush.bf16.msrb.mxu0 %v480_v43 }
 0x123   : > { %v884_v34 = vld.sshfl [vmem:[#allocation1 + $0x10] sm:$0xff pattern:$0x75316420] }
 0x124   : > { %v890_v38 = vpack.c.bf16 %v884_v34, %v884_v34  ;;  %968 = vst [vmem:[#allocation1 + $0x10] ss:$2 sm:$0xff] %v963_v30  ;;  %v883_v39 = vld.sshfl [vmem:[#allocation1 + $0x8] sm:$0xff pattern:$0x75316420]  ;;  %v1281_v34 = vld [vmem:[%s1538_s1 + $0x40] sm:$0xff] }
 0x125   : > { %v889_v41 = vpack.c.bf16 %v883_v39, %v883_v39  ;;  %v882_v42 = vld.sshfl [vmem:[#allocation1] sm:$0xff pattern:$0x75316420]  ;;  %1221 = vmatmul.msk.bf16.vlgmr.msrb.gmra.mxu1 %vm329_vm9, %v1275_v36  ;;  %1220 = vmatmul.msk.bf16.vlgmr.msrb.gmra.mxu0 %vm329_vm9, %v1275_v36  ;;  %v391_v39 = vpop.f32.mrf.mxu2 }
 0x126   : > { %906 = vrot.lane.b32.xlu1 %v890_v38, %s1340_s27  ;;  %v888_v44 = vpack.c.bf16 %v882_v42, %v882_v42  ;;  %966 = vst [vmem:[#allocation1] ss:$2 sm:$0xff] %v962_v37 }
 0x127   : > { %904 = vrot.lane.b32.xlu0 %v889_v41, %s1340_s27  ;;  %v557_v45 = vpop.permute.xlu0 %556  ;;  %v559_v46 = vpop.permute.xlu1 %558 }
 0x128   : > { %902 = vrot.lane.b32.xlu2 %v888_v44, %s1340_s27  ;;  %v562_v47 = vsel %vm560_vm13, %v557_v45, %v559_v46  ;;  %v561_v55 = vsel %vm560_vm13, %v555_v52, %v557_v45 }
 0x129   : > { %v570_v48 = vsel %vm333_vm8, %v562_v47, 0  ;;  %v567_v60 = vsel %vm333_vm8, %v561_v55, 0 }
 0x12a   : > { %593 = vmatpush.bf16.msrb.mxu3 %v570_v48  ;;  %579 = vmatpush.bf16.msrb.mxu2 %v567_v60  ;;  %v405_v40 = vpop.f32.mrf.mxu3 }
 0x12b   : > { %v971_v51 = vld.sshfl [vmem:[#allocation1 + $0x10] sm:$0xff pattern:$0x75316420] }
 0x12c   : > { %v977_v54 = vpack.c.bf16 %v971_v51, %v971_v51 }
 0x12d   : > { %v970_v56 = vld.sshfl [vmem:[#allocation1 + $0x8] sm:$0xff pattern:$0x75316420]  ;;  %v969_v57 = vld.sshfl [vmem:[#allocation1] sm:$0xff pattern:$0x75316420]  ;;  %1229 = vmatmul.msk.bf16.vlgmr.msrb.gmra.mxu3 %vm329_vm9, %v1276_v53  ;;  %1228 = vmatmul.msk.bf16.vlgmr.msrb.gmra.mxu2 %vm329_vm9, %v1276_v53  ;;  %v393_v43 = vpop.f32.mrf.mxu2 }
 0x12e   : > { %993 = vrot.lane.b32.xlu1 %v977_v54, %s1341_s30  ;;  %v976_v58 = vpack.c.bf16 %v970_v56, %v970_v56  ;;  %v975_v59 = vpack.c.bf16 %v969_v57, %v969_v57 }
 0x12f   : > { %v644_v61 = vpop.permute.xlu0 %643  ;;  %v646_v62 = vpop.permute.xlu1 %645 }
 0x130   : > { %991 = vrot.lane.b32.xlu0 %v976_v58, %s1341_s30  ;;  %989 = vrot.lane.b32.xlu2 %v975_v59, %s1341_s30  ;;  %v649_v63 = vsel %vm647_vm14, %v644_v61, %v646_v62  ;;  %v648_v3 = vsel %vm647_vm14, %v642_v1, %v644_v61 }
 0x131   : > { %v657_v0 = vsel %vm333_vm8, %v649_v63, 0  ;;  %v654_v4 = vsel %vm333_vm8, %v648_v3, 0 }
 0x132   : > { %680 = vmatpush.bf16.msra.mxu1 %v657_v0  ;;  %666 = vmatpush.bf16.msra.mxu0 %v654_v4  ;;  %v407_v44 = vpop.f32.mrf.mxu3 }
 0x135   : > { %1237 = vmatmul.msk.bf16.vlgmr.msra.gmra.mxu1 %vm329_vm9, %v1277_v2  ;;  %1236 = vmatmul.msk.bf16.vlgmr.msra.gmra.mxu0 %vm329_vm9, %v1277_v2 }
 0x137   : > { %v731_v6 = vpop.permute.xlu0 %730  ;;  %v733_v9 = vpop.permute.xlu1 %732 }
 0x138   : > { %v735_v7 = vsel %vm734_vm15, %v729_v5, %v731_v6  ;;  %v736_v10 = vsel %vm734_vm15, %v731_v6, %v733_v9 }
 0x139   : > { %v741_v8 = vsel %vm333_vm8, %v735_v7, 0  ;;  %v744_v12 = vsel %vm333_vm8, %v736_v10, 0 }
 0x13a   : > { %753 = vmatpush.bf16.msra.mxu2 %v741_v8  ;;  %767 = vmatpush.bf16.msra.mxu3 %v744_v12 }
 0x13d   : > { %1244 = vmatmul.msk.bf16.vlgmr.msra.gmra.mxu2 %vm329_vm9, %v1278_v11  ;;  %1245 = vmatmul.msk.bf16.vlgmr.msra.gmra.mxu3 %vm329_vm9, %v1278_v11 }
 0x13f   : > { %v818_v14 = vpop.permute.xlu0 %817  ;;  %v820_v16 = vpop.permute.xlu1 %819 }
 0x140   : > { %v822_v49 = vsel %vm821_vm0, %v816_v13, %v818_v14  ;;  %v823_v17 = vsel %vm821_vm0, %v818_v14, %v820_v16 }
 0x141   : > { %v828_v15 = vsel %vm333_vm8, %v822_v49, 0  ;;  %v831_v18 = vsel %vm333_vm8, %v823_v17, 0 }
 0x142   : > { %840 = vmatpush.bf16.msrb.mxu0 %v828_v15  ;;  %854 = vmatpush.bf16.msrb.mxu1 %v831_v18 }
 0x145   : > { %1252 = vmatmul.msk.bf16.vlgmr.msrb.gmra.mxu0 %vm329_vm9, %v1279_v50  ;;  %1253 = vmatmul.msk.bf16.vlgmr.msrb.gmra.mxu1 %vm329_vm9, %v1279_v50 }
 0x182   : > { %v903_v19 = vpop.permute.xlu2 %902 }
 0x18a   : > { %v990_v28 = vpop.permute.xlu2 %989 }
 0x192   : > { %v349_v35 = vpop.f32.mrf.mxu0  ;;  %v363_v36 = vpop.f32.mrf.mxu1 }
 0x193   : > { %v392_v57 = vadd.f32 %v391_v39, %v349_v35  ;;  %v406_v58 = vadd.f32 %v405_v40, %v363_v36 }
 0x198   : > { %v907_v20 = vpop.permute.xlu1 %906 }
 0x199   : > { %v905_v21 = vpop.permute.xlu0 %904 }
 0x19a   : > { %v909_v22 = vsel %vm908_vm1, %v903_v19, %v905_v21  ;;  %v910_v23 = vsel %vm908_vm1, %v905_v21, %v907_v20  ;;  %v351_v37 = vpop.f32.mrf.mxu0  ;;  %v365_v38 = vpop.f32.mrf.mxu1 }
 0x19b   : > { %v915_v24 = vsel %vm333_vm8, %v909_v22, 0  ;;  %v918_v25 = vsel %vm333_vm8, %v910_v23, 0  ;;  %v394_v1 = vadd.f32 %v393_v43, %v351_v37  ;;  %v408_v2 = vadd.f32 %v407_v44, %v365_v38 }
 0x19c   : > { %927 = vmatpush.bf16.msrb.mxu2 %v915_v24  ;;  %941 = vmatpush.bf16.msrb.mxu3 %v918_v25 }
 0x19f   : > { %1260 = vmatmul.msk.bf16.vlgmr.msrb.gmra.mxu2 %vm329_vm9, %v1280_v26  ;;  %1261 = vmatmul.msk.bf16.vlgmr.msrb.gmra.mxu3 %vm329_vm9, %v1280_v26 }
 0x1a0   : > { %v994_v27 = vpop.permute.xlu1 %993 }
 0x1a2   : > { %v992_v29 = vpop.permute.xlu0 %991  ;;  %v494_v41 = vpop.f32.mrf.mxu0 }
 0x1a3   : > { %v996_v30 = vsel %vm995_vm2, %v990_v28, %v992_v29  ;;  %v997_v31 = vsel %vm995_vm2, %v992_v29, %v994_v27  ;;  %v508_v42 = vpop.f32.mrf.mxu1  ;;  %v513_v63 = vadd.f32 %v494_v41, %v392_v57 }
 0x1a4   : > { %v1002_v32 = vsel %vm333_vm8, %v996_v30, 0  ;;  %v1005_v33 = vsel %vm333_vm8, %v997_v31, 0  ;;  %v514_v0 = vadd.f32 %v508_v42, %v406_v58 }
 0x1a5   : > { %1014 = vmatpush.bf16.msra.mxu0 %v1002_v32  ;;  %1028 = vmatpush.bf16.msra.mxu1 %v1005_v33 }
 0x1a8   : > { %1268 = vmatmul.msk.bf16.vlgmr.msra.gmra.mxu0 %vm329_vm9, %v1281_v34  ;;  %1269 = vmatmul.msk.bf16.vlgmr.msra.gmra.mxu1 %vm329_vm9, %v1281_v34 }
 0x1aa   : > { %v496_v45 = vpop.f32.mrf.mxu0 }
 0x1ab   : > { %v510_v46 = vpop.f32.mrf.mxu1  ;;  %v515_v5 = vadd.f32 %v496_v45, %v394_v1 }
 0x1ac   : > { %v516_v6 = vadd.f32 %v510_v46, %v408_v2 }
 0x1b0   : > { %v581_v47 = vpop.f32.mrf.mxu2  ;;  %v595_v48 = vpop.f32.mrf.mxu3 }
 0x1b1   : > { %v600_v3 = vadd.f32 %v581_v47, %v513_v63  ;;  %v601_v4 = vadd.f32 %v595_v48, %v514_v0 }
 0x1b2   : > { %v668_v51 = vpop.f32.mrf.mxu0 }
 0x1b3   : > { %v682_v52 = vpop.f32.mrf.mxu1  ;;  %v687_v9 = vadd.f32 %v668_v51, %v600_v3 }
 0x1b4   : > { %v688_v10 = vadd.f32 %v682_v52, %v601_v4 }
 0x1b8   : > { %v583_v53 = vpop.f32.mrf.mxu2  ;;  %v597_v54 = vpop.f32.mrf.mxu3 }
 0x1b9   : > { %v602_v11 = vadd.f32 %v583_v53, %v515_v5  ;;  %v603_v14 = vadd.f32 %v597_v54, %v516_v6 }
 0x1ba   : > { %v670_v55 = vpop.f32.mrf.mxu0 }
 0x1bb   : > { %v684_v56 = vpop.f32.mrf.mxu1  ;;  %v689_v16 = vadd.f32 %v670_v55, %v602_v11 }
 0x1bc   : > { %v690_v50 = vadd.f32 %v684_v56, %v603_v14  ;;  %v1342_v14 = vmov 0  }
 0x1bd   : > { %1314 = vset.pattern.permute.xlu1 %v1342_v14  ;;  %1315 = vset.pattern.permute.xlu0 %v1342_v14 }
 0x1c0   : > { %v755_v59 = vpop.f32.mrf.mxu2  ;;  %v769_v60 = vpop.f32.mrf.mxu3 }
 0x1c1   : > { %v774_v49 = vadd.f32 %v755_v59, %v687_v9  ;;  %v775_v15 = vadd.f32 %v769_v60, %v688_v10 }
 0x1c2   : > { %v842_v61 = vpop.f32.mrf.mxu0 }
 0x1c3   : > { %v856_v62 = vpop.f32.mrf.mxu1  ;;  %v861_v19 = vadd.f32 %v842_v61, %v774_v49  ;;  %v1090_v49 = vld [vmem:[%s1540_s3] sm:$0xff] }
 0x1c4   : > { %v862_v20 = vadd.f32 %v856_v62, %v775_v15 }
 0x1c8   : > { %v757_v7 = vpop.f32.mrf.mxu2  ;;  %v771_v8 = vpop.f32.mrf.mxu3 }
 0x1c9   : > { %v776_v21 = vadd.f32 %v757_v7, %v689_v16  ;;  %v777_v24 = vadd.f32 %v771_v8, %v690_v50  ;;  %v1091_v50 = vld [vmem:[%s1540_s3 + $0x8] sm:$0xff] }
 0x1ca   : > { %v844_v12 = vpop.f32.mrf.mxu0 }
 0x1cb   : > { %v858_v13 = vpop.f32.mrf.mxu1  ;;  %v863_v27 = vadd.f32 %v844_v12, %v776_v21 }
 0x1cc   : > { %v864_v28 = vadd.f32 %v858_v13, %v777_v24 }
 0x222   : > { %v929_v17 = vpop.f32.mrf.mxu2  ;;  %v943_v18 = vpop.f32.mrf.mxu3 }
 0x223   : > { %v948_v25 = vadd.f32 %v929_v17, %v861_v19  ;;  %v949_v26 = vadd.f32 %v943_v18, %v862_v20  ;;  %v1095_v19 = vld [vmem:[%s1541_s4] sm:$0xff] }
 0x225   : > { %v1016_v22 = vpop.f32.mrf.mxu0  ;;  %v1030_v23 = vpop.f32.mrf.mxu1 }
 0x226   : > { %v1498_v29 = vadd.f32 %v1016_v22, %v948_v25  ;;  %v1500_v30 = vadd.f32 %v1030_v23, %v949_v26  ;;  %v1096_v22 = vld [vmem:[%s1541_s4 + $0x8] sm:$0xff] }
 0x228   : > { %v1039_v37 = vadd.f32 %v1500_v30, %v1498_v29 }
 0x22a   : > { %v931_v31 = vpop.f32.mrf.mxu2  ;;  %v945_v32 = vpop.f32.mrf.mxu3 }
 0x22b   : > { %v950_v33 = vadd.f32 %v931_v31, %v863_v27  ;;  %v951_v34 = vadd.f32 %v945_v32, %v864_v28 }
 0x22d   : > { %v1018_v35 = vpop.f32.mrf.mxu0  ;;  %v1032_v36 = vpop.f32.mrf.mxu1 }
 0x22e   : > { %v1504_v38 = vadd.f32 %v1018_v35, %v950_v33  ;;  %v1506_v39 = vadd.f32 %v1032_v36, %v951_v34 }
 0x230   : > { %v1040_v40 = vadd.f32 %v1039_v37, %v1504_v38 }
 0x232   : > { %v1041_v41 = vadd.f32 %v1040_v40, %v1506_v39 }
 0x234   : > { %1042 = vadd.xlane.f32.xlu2 %v1041_v41 }
 0x2a7   : > { %v1043_v42 = vpop.xlane.xlu2 %1042 }
 0x2a8   : > { %v1044_v43 = vrot.slane %v1043_v42, 4 }
 0x2aa   : > { %v1045_v44 = vadd.f32 %v1044_v43, %v1043_v42 }
 0x2ac   : > { %v1046_v45 = vrot.slane %v1045_v44, 2 }
 0x2ae   : > { %v1047_v46 = vadd.f32 %v1046_v45, %v1045_v44 }
 0x2b0   : > { %v1048_v47 = vrot.slane %v1047_v46, 1 }
 0x2b2   : > { %v1049_v48 = vadd.f32 %v1048_v47, %v1047_v46 }
 0x2b4   : > { %1283 = vpush %v1049_v48 }
 0x2e5   : > { %s1284_s16 = spop %1283 }
 0x2e6   : > { %s1051_s17 = smul.f32 0.00048828125, %s1284_s16 }
 0x2e8   : > { %v1052_v51 = vstv %s1051_s17  ;;  %s1073_s20 = smul.f32 2048.0, %s1051_s17 }
 0x2e9   : > { %v1053_v52 = vsub.f32 %v1498_v29, %v1052_v51  ;;  %v1054_v53 = vsub.f32 %v1500_v30, %v1052_v51  ;;  %v1055_v54 = vsub.f32 %v1504_v38, %v1052_v51  ;;  %v1056_v55 = vsub.f32 %v1506_v39, %v1052_v51 }
 0x2ea   : > { %s1074_s21 = smul.f32 %s1073_s20, %s1051_s17 }
 0x2eb   : > { %v1057_v56 = vmul.f32 %v1053_v52, %v1053_v52  ;;  %v1058_v57 = vmul.f32 %v1054_v53, %v1054_v53  ;;  %v1059_v58 = vmul.f32 %v1055_v54, %v1055_v54  ;;  %v1060_v60 = vmul.f32 %v1056_v55, %v1056_v55 }
 0x2ed   : > { %v1061_v59 = vadd.f32 %v1058_v57, %v1057_v56 }
 0x2ef   : > { %v1062_v61 = vadd.f32 %v1061_v59, %v1059_v58 }
 0x2f1   : > { %v1063_v62 = vadd.f32 %v1062_v61, %v1060_v60 }
 0x2f3   : > { %1064 = vadd.xlane.f32.xlu0 %v1063_v62 }
 0x366   : > { %v1065_v63 = vpop.xlane.xlu0 %1064 }
 0x367   : > { %v1066_v0 = vrot.slane %v1065_v63, 4 }
 0x369   : > { %v1067_v1 = vadd.f32 %v1066_v0, %v1065_v63 }
 0x36b   : > { %v1068_v2 = vrot.slane %v1067_v1, 2 }
 0x36d   : > { %v1069_v3 = vadd.f32 %v1068_v2, %v1067_v1 }
 0x36f   : > { %v1070_v4 = vrot.slane %v1069_v3, 1 }
 0x371   : > { %v1071_v5 = vadd.f32 %v1070_v4, %v1069_v3 }
 0x373   : > { %1285 = vpush %v1071_v5 }
 0x3a4   : > { %s1286_s22 = spop %1285 }
 0x3a5   : > { %s1075_s23 = ssub.f32 %s1286_s22, %s1074_s21 }
 0x3a7   : > { %s1076_s24 = smul.f32 0.00048828125, %s1075_s23 }
 0x3a9   : > { %s1077_s25 = sadd.f32 1e-05, %s1076_s24 }
 0x3ab   : > { %v1078_v6 = vstv %s1077_s25 }
 0x3ac   : > { %1316 = vrsqrt.f32 %v1078_v6  ;;  %vm1085_vm4 = vweird.f32 %v1078_v6 }
 0x3b2   : > { %v1317_v7 = vpop.eup %1316 }
 0x3b3   : > { %v1080_v8 = vmul.f32 %v1317_v7, %v1078_v6  ;;  %vm1086_vm3 = vweird.f32 %v1317_v7 }
 0x3b4   : > { %vm1087_vm5 = vmor %vm1085_vm4, %vm1086_vm3 }
 0x3b5   : > { %v1081_v9 = vmul.f32 %v1317_v7, %v1080_v8 }
 0x3b7   : > { %v1082_v10 = vmul.f32 0.5, %v1081_v9 }
 0x3b9   : > { %v1083_v11 = vsub.f32 1.5, %v1082_v10 }
 0x3bb   : > { %v1084_v12 = vmul.f32 %v1317_v7, %v1083_v11 }
 0x3bd   : > { %v1088_v13 = vsel %vm1087_vm5, %v1317_v7, %v1084_v12 }
 0x3be   : > { %1287 = vpush %v1088_v13 }
 0x3ef   : > { %s1288_s28 = spop %1287 }
 0x3f0   : > { %v1092_v15 = vstv %s1288_s28 }
 0x3f1   : > { %v1093_v16 = vmul.f32 %v1092_v15, %v1090_v49  ;;  %v1094_v17 = vmul.f32 %v1092_v15, %v1091_v50 }
 0x3f3   : > { %1103 = vperm.xlu1 %1314, %v1093_v16   ;;  %v1097_v18 = vmul.f32 %v1093_v16, %v1052_v51  ;;  %v1098_v21 = vmul.f32 %v1094_v17, %v1052_v51 }
 0x3f5   : > { %v1099_v20 = vsub.f32 %v1095_v19, %v1097_v18  ;;  %v1100_v23 = vsub.f32 %v1096_v22, %v1098_v21 }
 0x3fb   : > { %1108 = vperm.xlu1 %1314, %v1094_v17  }
 0x403   : > { %1117 = vperm.xlu1 %1314, %v1099_v20  }
 0x40b   : > { %1122 = vperm.xlu1 %1314, %v1100_v23  }
 0x465   : > { %v1104_v24 = vpop.permute.xlu1 %1103 }
 0x466   : > { %v1111_v26 = vmul.f32 %v1104_v24, %v1498_v29  ;;  %v1112_v27 = vmul.f32 %v1104_v24, %v1500_v30 }
 0x46d   : > { %v1109_v25 = vpop.permute.xlu1 %1108 }
 0x46e   : > { %v1113_v35 = vmul.f32 %v1109_v25, %v1504_v38  ;;  %v1114_v36 = vmul.f32 %v1109_v25, %v1506_v39 }
 0x475   : > { %v1118_v28 = vpop.permute.xlu1 %1117 }
 0x476   : > { %v1125_v31 = vadd.f32 %v1118_v28, %v1111_v26  ;;  %v1126_v32 = vadd.f32 %v1118_v28, %v1112_v27 }
 0x478   : > { %v1129_v33 = vmax.f32 %v1125_v31, 0.0  ;;  %v1130_v34 = vmax.f32 %v1126_v32, 0.0 }
 0x47a   : > { %1133 = vst [vmem:[%s224_s13] sm:$0xff] %v1129_v33 }
 0x47b   : > { %1134 = vst [vmem:[%s224_s13 + $0x8] sm:$0xff] %v1130_v34 }
 0x47d   : > { %v1123_v37 = vpop.permute.xlu1 %1122 }
 0x47e   : > { %v1127_v29 = vadd.f32 %v1123_v37, %v1113_v35  ;;  %v1128_v40 = vadd.f32 %v1123_v37, %v1114_v36 }
 0x480   : > { %v1131_v30 = vmax.f32 %v1127_v29, 0.0  ;;  %v1132_v41 = vmax.f32 %v1128_v40, 0.0 }
 0x482   : > { %1135 = vst [vmem:[%s224_s13 + $0x10] sm:$0xff] %v1131_v30 }
 0x483   : > { %1136 = vst [vmem:[%s224_s13 + $0x18] sm:$0xff] %v1132_v41 }
 0x484 PF: > { %s15_s18 = sadd.s32 1, %s1324_s18  }
 0x485   : > { %p12_p4 = scmp.ge.s32.totalorder %s15_s18, 4  }
 0x487   :  { %14 = sbr.rel (!%p12_p4) target bundleno = 1 (0x1), region = 86 }

</bundles_post_ra>
